<compile_context>
chip_gen: v6e
topology: v6e:2x2x1
jax: 0.10.0
libtpu: 0.0.40
codegen_flags: <defaults>
</compile_context>

<pallas_src>
import jax
import jax.numpy as jnp
from jax.experimental import pallas as pl
from jax.experimental.pallas import tpu as pltpu


def _seq_attn_kernel(x_ref, w_ref, b_ref, ctx_ref, attn_ref):
    # x_ref   : (B_TILE, S, H) VMEM block of lstm_output
    # w_ref   : (1, H)         VMEM lane-dense attention weight
    # b_ref   : (1,)           SMEM scalar bias
    # ctx_ref : (B_TILE, H)    output context vectors
    # attn_ref: (B_TILE, S)    output attention weights (lane-dense)
    x = x_ref[...]                                   # (B_TILE, S, H)
    h = x.shape[-1]
    w = w_ref[...].reshape(1, 1, h)                  # (1, 1, H)
    bias = b_ref[0]

    # Linear(H -> 1): VPU multiply + lane (H) reduction, f32 accumulation.
    scores = jnp.sum((x * w).astype(jnp.float32), axis=-1) + bias   # (B_TILE, S)

    # Softmax over the sequence axis (lane axis of the (B_TILE, S) layout).
    m = jnp.max(scores, axis=-1, keepdims=True)                     # (B_TILE, 1)
    e = jnp.exp(scores - m)                                         # (B_TILE, S)
    denom = jnp.sum(e, axis=-1, keepdims=True)                      # (B_TILE, 1)
    attn = e / denom                                                # per-row divide

    # context = sum_over_seq(attn * x); multiply in input dtype, accumulate f32.
    weighted = attn.astype(x.dtype)[:, :, None] * x                 # (B_TILE, S, H)
    ctx = jnp.sum(weighted.astype(jnp.float32), axis=1)             # (B_TILE, H)

    ctx_ref[...] = ctx.astype(ctx_ref.dtype)
    attn_ref[...] = attn.astype(attn_ref.dtype)


def _choose_b_tile(B, S, H, itemsize):
    """Pick a batch tile that (a) keeps a double-buffered x block within a
    conservative per-buffer VMEM budget, (b) is either the whole batch or a
    multiple of 8 (clean sublane tiling for the 2-D outputs), and (c) leaves
    >= 2 grid steps for large batches so both v7x TensorCores get work."""
    bytes_per_row = max(1, S * H * itemsize)
    budget_bytes = 4 << 20                       # per buffer (~8 MiB double-buffered)
    rows_fit = max(1, budget_bytes // bytes_per_row)

    if rows_fit >= B:
        if B >= 16:
            # Whole batch fits, but split into >= 2 parallel, multiple-of-8 tiles.
            half = -(-B // 2)
            return ((half + 7) // 8) * 8
        return B                                  # single block, grid = 1
    # Batch needs tiling for VMEM: biggest multiple-of-8 tile within budget.
    if rows_fit >= 8:
        return (rows_fit // 8) * 8
    return 8                                      # huge rows: min clean tile


def sequence_attention_layer(lstm_output, attn_w, attn_b):
    """lstm_output: (B, S, H); attn_w: (H, 1); attn_b: (1,)
    -> (context_vector (B, H), attention_weights (B, S, 1))."""
    B, S, H = lstm_output.shape
    dtype = lstm_output.dtype
    itemsize = jnp.dtype(dtype).itemsize

    b_tile = _choose_b_tile(B, S, H, itemsize)
    num_tiles = -(-B // b_tile)
    b_pad = num_tiles * b_tile

    x_in = lstm_output
    if b_pad != B:
        # Pad the batch so every grid step sees a full tile; padded rows produce
        # harmless values (uniform softmax over zeros) and are sliced off below.
        x_in = jnp.concatenate(
            [lstm_output, jnp.zeros((b_pad - B, S, H), dtype=dtype)], axis=0)

    w_row = attn_w.reshape(1, H).astype(dtype)        # lane-dense weight
    bias = attn_b.reshape(1).astype(jnp.float32)      # scalar bias -> SMEM

    ctx, attn2d = pl.pallas_call(
        _seq_attn_kernel,
        out_shape=(
            jax.ShapeDtypeStruct((b_pad, H), dtype),
            jax.ShapeDtypeStruct((b_pad, S), dtype),
        ),
        grid_spec=pltpu.PrefetchScalarGridSpec(
            num_scalar_prefetch=0,
            grid=(num_tiles,),
            in_specs=[
                pl.BlockSpec((b_tile, S, H), lambda i: (i, 0, 0)),
                pl.BlockSpec((1, H), lambda i: (0, 0)),
                pl.BlockSpec(memory_space=pltpu.MemorySpace.SMEM),
            ],
            out_specs=[
                pl.BlockSpec((b_tile, H), lambda i: (i, 0)),
                pl.BlockSpec((b_tile, S), lambda i: (i, 0)),
            ],
        ),
        compiler_params=pltpu.CompilerParams(
            dimension_semantics=("parallel",)),
    )(x_in, w_row, bias)

    ctx = ctx[:B]
    attn = attn2d[:B].reshape(B, S, 1)
    return ctx, attn


def _reference(lstm_output, attn_w, attn_b):
    scores = jnp.einsum("bsh,ho->bso", lstm_output, attn_w) + attn_b  # (B,S,1)
    attn = jax.nn.softmax(scores, axis=1)
    ctx = jnp.sum(attn * lstm_output, axis=1)
    return ctx, attn


if __name__ == "__main__":
    B, S, H = 2, 8, 32
    key = jax.random.PRNGKey(0)
    kx, kw, kb = jax.random.split(key, 3)

    lstm_output = jax.random.normal(kx, (B, S, H), dtype=jnp.float32)
    # Deterministic parameter init mimicking nn.Linear(H, 1) uniform(-1/sqrt(H), 1/sqrt(H))
    bound = 1.0 / jnp.sqrt(jnp.float32(H))
    attn_w = jax.random.uniform(kw, (H, 1), minval=-bound, maxval=bound, dtype=jnp.float32)
    attn_b = jax.random.uniform(kb, (1,), minval=-bound, maxval=bound, dtype=jnp.float32)

    ctx, attn = sequence_attention_layer(lstm_output, attn_w, attn_b)
    jax.block_until_ready((ctx, attn))

    ctx_ref, attn_ref = _reference(lstm_output, attn_w, attn_b)
    assert ctx.shape == (B, H) and attn.shape == (B, S, 1)
    assert jnp.allclose(ctx, ctx_ref, atol=1e-5, rtol=1e-5)
    assert jnp.allclose(attn, attn_ref, atol=1e-5, rtol=1e-5)

    print("KERNEL_OK")
</pallas_src>

<mosaic_0001>
module attributes {stable_mosaic.version = 11 : i64} {
  func.func @_seq_attn_kernel(%arg0: i32, %arg1: memref<2x8x32xf32, #tpu.memory_space<vmem>>, %arg2: memref<1x32xf32, #tpu.memory_space<vmem>>, %arg3: memref<1xf32, #tpu.memory_space<smem>>, %arg4: memref<2x32xf32, #tpu.memory_space<vmem>>, %arg5: memref<2x8xf32, #tpu.memory_space<vmem>>) attributes {dimension_semantics = [#tpu.dimension_semantics<parallel>], iteration_bounds = array<i64: 1>, scalar_prefetch = 0 : i64, scratch_operands = 0 : i64, tpu.core_type = #tpu.core_type<tc>, window_params = [{transform_indices = @transform_0, window_bounds = array<i64: 2, 8, 32>}, {pipeline_mode = #tpu.pipeline_mode<synchronous>, transform_indices = @transform_1, window_bounds = array<i64: 1, 32>}, {transform_indices = @transform_2, window_bounds = array<i64: 1>}, {transform_indices = @transform_3, window_bounds = array<i64: 2, 32>}, {transform_indices = @transform_4, window_bounds = array<i64: 2, 8>}]} {
    %c0 = arith.constant 0 : index
    %c0_0 = arith.constant 0 : index
    %c0_1 = arith.constant 0 : index
    %0 = vector.load %arg1[%c0, %c0_0, %c0_1] : memref<2x8x32xf32, #tpu.memory_space<vmem>>, vector<2x8x32xf32>
    %c0_2 = arith.constant 0 : index
    %c0_3 = arith.constant 0 : index
    %1 = vector.load %arg2[%c0_2, %c0_3] : memref<1x32xf32, #tpu.memory_space<vmem>>, vector<1x32xf32>
    %2 = vector.shape_cast %1 : vector<1x32xf32> to vector<1x1x32xf32>
    %c0_4 = arith.constant 0 : index
    %3 = memref.load %arg3[%c0_4] : memref<1xf32, #tpu.memory_space<smem>>
    %4 = vector.broadcast %2 : vector<1x1x32xf32> to vector<2x8x32xf32>
    %5 = arith.mulf %0, %4 : vector<2x8x32xf32>
    %cst = arith.constant dense<0.000000e+00> : vector<2x8xf32>
    %6 = vector.multi_reduction <add>, %5, %cst [2] : vector<2x8x32xf32> to vector<2x8xf32>
    %7 = vector.broadcast %3 : f32 to vector<2x8xf32>
    %8 = arith.addf %6, %7 : vector<2x8xf32>
    %cst_5 = arith.constant dense<0xFF800000> : vector<2xf32>
    %9 = vector.multi_reduction <maximumf>, %8, %cst_5 [1] : vector<2x8xf32> to vector<2xf32>
    %10 = vector.shape_cast %9 : vector<2xf32> to vector<2x1xf32>
    %11 = vector.broadcast %10 : vector<2x1xf32> to vector<2x8xf32>
    %12 = arith.subf %8, %11 : vector<2x8xf32>
    %13 = math.exp %12 : vector<2x8xf32>
    %cst_6 = arith.constant dense<0.000000e+00> : vector<2xf32>
    %14 = vector.multi_reduction <add>, %13, %cst_6 [1] : vector<2x8xf32> to vector<2xf32>
    %15 = vector.shape_cast %14 : vector<2xf32> to vector<2x1xf32>
    %16 = vector.broadcast %15 : vector<2x1xf32> to vector<2x8xf32>
    %17 = arith.divf %13, %16 : vector<2x8xf32>
    %18 = vector.shape_cast %17 : vector<2x8xf32> to vector<2x8x1xf32>
    %19 = vector.broadcast %18 : vector<2x8x1xf32> to vector<2x8x32xf32>
    %20 = arith.mulf %19, %0 : vector<2x8x32xf32>
    %cst_7 = arith.constant dense<0.000000e+00> : vector<2x32xf32>
    %21 = vector.multi_reduction <add>, %20, %cst_7 [1] : vector<2x8x32xf32> to vector<2x32xf32>
    %c0_8 = arith.constant 0 : index
    %c0_9 = arith.constant 0 : index
    %22 = vector.load %arg4[%c0_8, %c0_9] : memref<2x32xf32, #tpu.memory_space<vmem>>, vector<2x32xf32>
    tpu.vector_store %arg4[%c0_8, %c0_9], %21 {strides = array<i32>} : memref<2x32xf32, #tpu.memory_space<vmem>>, vector<2x32xf32>,
    %c0_10 = arith.constant 0 : index
    %c0_11 = arith.constant 0 : index
    %23 = vector.load %arg5[%c0_10, %c0_11] : memref<2x8xf32, #tpu.memory_space<vmem>>, vector<2x8xf32>
    tpu.vector_store %arg5[%c0_10, %c0_11], %17 {strides = array<i32>} : memref<2x8xf32, #tpu.memory_space<vmem>>, vector<2x8xf32>,
    return
  }
  func.func @transform_0(%arg0: i32) -> (i32, i32, i32) {
    %c0_i32 = arith.constant 0 : i32
    %c0_i32_0 = arith.constant 0 : i32
    %c0_i32_1 = arith.constant 0 : i32
    return %arg0, %c0_i32, %c0_i32_0 : i32, i32, i32
  }
  func.func @transform_1(%arg0: i32) -> (i32, i32) {
    %c0_i32 = arith.constant 0 : i32
    %c0_i32_0 = arith.constant 0 : i32
    %c0_i32_1 = arith.constant 0 : i32
    return %c0_i32, %c0_i32_0 : i32, i32
  }
  func.func @transform_2(%arg0: i32) -> i32 {
    %c0_i32 = arith.constant 0 : i32
    %c0_i32_0 = arith.constant 0 : i32
    return %c0_i32 : i32
  }
  func.func @transform_3(%arg0: i32) -> (i32, i32) {
    %c0_i32 = arith.constant 0 : i32
    %c0_i32_0 = arith.constant 0 : i32
    return %arg0, %c0_i32 : i32, i32
  }
  func.func @transform_4(%arg0: i32) -> (i32, i32) {
    %c0_i32 = arith.constant 0 : i32
    %c0_i32_0 = arith.constant 0 : i32
    return %arg0, %c0_i32 : i32, i32
  }
}

</mosaic_0001>

<bundles_post_ra>
// kernel: tpu_custom_call.1
= control target key start
LH: loop header
LB: loop body
LE: loop exit
PB: predicated region body
PF: predicated region fallthrough
CT: control target
= control target key end

     0   :  { %11 = vsyncpa [#allocation4], 0  ;;  %s347_s0 = inlined_call_operand.hbm [shape: f32[2,8,32], index: 0, kind: input, shape index: {}]   ;;  %s348_s1 = inlined_call_operand.vmem [shape: f32[1,32], index: 1, kind: input, shape index: {}]   ;;  %s349_s2 = inlined_call_operand.<no memory space> [shape: f32[1], index: 2, kind: input, shape index: {}]   ;;  %s350_s3 = inlined_call_operand.hbm [shape: f32[2,32], index: 3, kind: output, shape index: {0}]   ;;  %s351_s4 = inlined_call_operand.hbm [shape: f32[2,8], index: 4, kind: output, shape index: {1}]  }
   0x1   :  { %12 = vsyncpa [#allocation5], 0 }
   0x2   :  { %13 = vsyncpa [#allocation8], 0  ;;  %s282_s15 = smov [#allocation3]  }
   0x3   :  { %s19_s16 = sshll.u32 %s282_s15, 4  ;;  %s20_s16 = int_to_ptr.vmem [resolvable:$true] %s19_s16 }
   0x4   :  { %s224_s17 = scalar_lea.vmem %s20_s16, 256  ;;  %p229_p1 = scmp.lt.s32.totalorder %s20_s16, %s20_s16 }
   0x5   :  { %p225_p0 = scmp.ne.s32.totalorder %s20_s16, %s224_s17  ;;  %p230_p2 = scmp.lt.s32.totalorder %s224_s17, %s224_s17 }
   0x7   :  { %p231_p3 = por %p230_p2, %p229_p1 }
   0x9   :  { %p232_p4 = pnand %p231_p3, %p225_p0 }
   0xb   :  { %235 = shalt.err (!%p232_p4)
}
   0xc   :  { %s283_s18 = smov 128   ;;  %s284_s19 = smov 8  }
   0xd   :  { %25 = dma.hbm_to_vmem [thread:$0]  %s347_s0, 256, %s20_s16, [#allocation4], %s283_s18, %s283_s18, %s284_s19  }
   0xe   :  { %276 = dma.done.wait [#allocation4], 256  }
   0xf   :  { %277 = vsyncadd [#allocation4], 4294967040  ;;  %v316_v0 = vld [vmem:[#allocation3] sm:$0xff]  ;;  %vm45_vm0 = vcmask 261120   ;;  %v321_v2 = vld [vmem:[#allocation3 + $0x8] sm:$0xff]  ;;  %v57_v7 = vlaneseq  ;;  %v52_v10 = vstv %s349_s2  ;;  %vm67_vm1 = vcmask 1041409  }
  0x10   :  { %v199_v1 = vld [vmem:[%s348_s1] ss:$0 sm:$0xff]  ;;  %vm70_vm2 = vcmask 58368   ;;  %v285_v20 = vmov 0   ;;  %s286_s1 = smov [#allocation7]  }
  0x11   :  { %v43_v3 = vmul.f32 %v199_v1, %v316_v0  ;;  %v44_v4 = vmul.f32 %v199_v1, %v321_v2  ;;  %v58_v8 = vand.u32 127, %v57_v7  ;;  %v60_v9 = vshrl.u32 %v57_v7, 7  ;;  %207 = vset.pattern.permute.xlu0 %v285_v20  ;;  %206 = vset.pattern.permute.xlu1 %v285_v20  ;;  %s186_s2 = sshll.u32 %s286_s1, 4  ;;  %s187_s2 = int_to_ptr.vmem [resolvable:$true] %s186_s2 }
  0x12   :  { %s236_s25 = scalar_lea.vmem %s187_s2, 32  ;;  %p241_p6 = scmp.lt.s32.totalorder %s187_s2, %s187_s2 }
  0x13   :  { %v46_v5 = vsel %vm45_vm0, %v43_v3, 0.0  ;;  %v49_v6 = vsel %vm45_vm0, %v44_v4, 0.0  ;;  %v61_v12 = vsub.s32 %v58_v8, %v60_v9  ;;  %v77_v21 = vsub.s32 0, %v60_v9  ;;  %p237_p5 = scmp.ne.s32.totalorder %s187_s2, %s236_s25  ;;  %p242_p7 = scmp.lt.s32.totalorder %s236_s25, %s236_s25 }
  0x14   :  { %47 = vadd.xlane.f32.xlu0 %v46_v5  ;;  %v81_v22 = vsub.s32 1, %v60_v9 }
  0x15   :  { %p243_p8 = por %p242_p7, %p241_p6 }
  0x17   :  { %p244_p9 = pnand %p243_p8, %p237_p5 }
  0x18   :  { %50 = vadd.xlane.f32.xlu0 %v49_v6 }
  0x9d   :  { %v48_v11 = vpop.xlane.xlu0 %47 }
  0x9e   :  { %v53_v13 = vadd.f32 %v52_v10, %v48_v11 }
  0xa0   :  { %v62_v16 = vrot.slane %v53_v13, %v61_v12 }
  0xa1   :  { %v51_v14 = vpop.xlane.xlu0 %50 }
  0xa2   :  { %v54_v15 = vadd.f32 %v52_v10, %v51_v14 }
  0xa4   :  { %v66_v17 = vrot.slane %v54_v15, %v61_v12 }
  0xa6   :  { %v68_v18 = vsel %vm67_vm1, %v66_v17, %v62_v16 }
  0xa7   :  { %v71_v19 = vsel %vm70_vm2, %v68_v18, -inf }
  0xa8   :  { %72 = vmax.xlane.f32.xlu1 %v71_v19 }
 0x131   :  { %v73_v23 = vpop.xlane.xlu1 %72 }
 0x132   :  { %v78_v24 = vrot.slane %v73_v23, %v77_v21  ;;  %v82_v25 = vrot.slane %v73_v23, %v81_v22 }
 0x134   :  { %v85_v26 = vsub.f32 %v53_v13, %v78_v24  ;;  %v86_v27 = vsub.f32 %v54_v15, %v82_v25 }
 0x136   :  { %v87_v28 = vmul.f32 1.442695, %v85_v26  ;;  %v89_v29 = vmul.f32 1.442695, %v86_v27 }
 0x138   :  { %208 = vpow2.f32 %v87_v28 }
 0x139   :  { %210 = vpow2.f32 %v89_v29 }
 0x145   :  { %v209_v30 = vpop.eup %208 }
 0x146   :  { %v211_v31 = vpop.eup %210  ;;  %94 = vperm.xlu1 %206, %v209_v30  }
 0x147   :  { %97 = vperm.xlu0 %207, %v211_v31  }
 0x1c1   :  { %v95_v32 = vpop.permute.xlu1 %94 }
 0x1c2   :  { %v98_v33 = vpop.permute.xlu0 %97  ;;  %v102_v34 = vrot.slane %v95_v32, %v61_v12 }
 0x1c3   :  { %v106_v35 = vrot.slane %v98_v33, %v61_v12 }
 0x1c5   :  { %v107_v36 = vsel %vm67_vm1, %v106_v35, %v102_v34 }
 0x1c6   :  { %v109_v37 = vsel %vm70_vm2, %v107_v36, 0.0 }
 0x1c7   :  { %110 = vadd.xlane.f32.xlu1 %v109_v37 }
 0x250   :  { %v111_v38 = vpop.xlane.xlu1 %110 }
 0x251   :  { %v116_v39 = vrot.slane %v111_v38, %v77_v21  ;;  %v120_v40 = vrot.slane %v111_v38, %v81_v22 }
 0x253   :  { %212 = vrcp.f32 %v116_v39 }
 0x254   :  { %214 = vrcp.f32 %v120_v40 }
 0x260   :  { %v213_v41 = vpop.eup %212 }
 0x261   :  { %v124_v42 = vmul.f32 %v213_v41, %v209_v30  ;;  %v215_v43 = vpop.eup %214 }
 0x262   :  { %v126_v44 = vmul.f32 %v215_v43, %v211_v31 }
 0x263   :  { %129 = vperm.xlu0 %207, %v124_v42  }
 0x267   :  { %134 = vperm.xlu0 %207, %v126_v44  }
 0x2de   :  { %v130_v45 = vpop.permute.xlu0 %129 }
 0x2df   :  { %v137_v46 = vmul.f32 %v130_v45, %v316_v0  ;;  %v162_v50 = vrot.slane %v130_v45, %v61_v12 }
 0x2e1   :  { %v139_v47 = vsel %vm45_vm0, %v137_v46, 0.0 }
 0x2e2   :  { %v140_v48 = vrot.slane %v139_v47, 4  ;;  %v135_v49 = vpop.permute.xlu0 %134 }
 0x2e3   :  { %v138_v51 = vmul.f32 %v135_v49, %v321_v2  ;;  %v166_v52 = vrot.slane %v135_v49, %v61_v12 }
 0x2e4   :  { %v141_v53 = vadd.f32 %v140_v48, %v139_v47 }
 0x2e5   :  { %v146_v54 = vsel %vm45_vm0, %v138_v51, 0.0  ;;  %v167_v55 = vsel %vm67_vm1, %v166_v52, %v162_v50 }
 0x2e6   :  { %v142_v56 = vrot.slane %v141_v53, 2  ;;  %v147_v57 = vrot.slane %v146_v54, 4  ;;  %169 = vst.msk [vmem:[#allocation7] sm:$0x3] %vm70_vm2, %v167_v55 }
 0x2e7   :  { %247 = shalt.err (!%p244_p9)
}
 0x2e8   :  { %189 = dma.vmem_to_hbm [thread:$0]  %s187_s2, 32, %s351_s4, [#allocation8]   ;;  %v143_v58 = vadd.f32 %v142_v56, %v141_v53  ;;  %v148_v59 = vadd.f32 %v147_v57, %v146_v54  ;;  %vm157_vm3 = vcmask 254976  }
 0x2e9   :  { %s287_s28 = smov [#allocation6]  }
 0x2ea   :  { %v149_v60 = vrot.slane %v148_v59, 2  ;;  %v144_v61 = vrot.slane %v143_v58, 1  ;;  %s176_s29 = sshll.u32 %s287_s28, 4  ;;  %s177_s29 = int_to_ptr.vmem [resolvable:$true] %s176_s29 }
 0x2eb   :  { %s256_s30 = scalar_lea.vmem %s177_s29, 32  ;;  %p261_p11 = scmp.lt.s32.totalorder %s177_s29, %s177_s29 }
 0x2ec   :  { %v150_v62 = vadd.f32 %v149_v60, %v148_v59  ;;  %v145_v1 = vadd.f32 %v144_v61, %v143_v58  ;;  %p257_p10 = scmp.ne.s32.totalorder %s177_s29, %s256_s30  ;;  %p262_p12 = scmp.lt.s32.totalorder %s256_s30, %s256_s30 }
 0x2ee   :  { %v151_v63 = vrot.slane %v150_v62, 1  ;;  %p263_p13 = por %p262_p12, %p261_p11 }
 0x2f0   :  { %v152_v0 = vadd.f32 %v151_v63, %v150_v62  ;;  %p264_p0 = pnand %p263_p13, %p257_p10 }
 0x2f2   :  { %v155_v2 = vsel %vm67_vm1, %v152_v0, %v145_v1 }
 0x2f3   :  { %158 = vst.msk [vmem:[#allocation6] sm:$0x3] %vm157_vm3, %v155_v2 }
 0x2f4   :  { %267 = shalt.err (!%p264_p0)
}
 0x2f5   :  { %179 = dma.vmem_to_hbm [thread:$0]  %s177_s29, 32, %s350_s3, [#allocation5]  }
 0x2f6   :  { %278 = dma.done.wait [#allocation5], 32  }
 0x2f7   :  { %279 = vsyncadd [#allocation5], 4294967264 }
 0x2f8   :  { %280 = dma.done.wait [#allocation8], 32  }
 0x2f9   :  { %281 = vsyncadd [#allocation8], 4294967264 }
 0x2fa   :  { %196 = vsyncpa [#allocation4], 1 }
 0x2fb   :  { %197 = vsyncpa [#allocation5], 1 }
 0x2fc   :  { %198 = vsyncpa [#allocation8], 1 }

</bundles_post_ra>
